<compile_context>
chip_gen: v5e
topology: v5e:2x2
jax: 0.10.0
libtpu: 0.0.40
codegen_flags: <defaults>
</compile_context>

<pallas_src>
import functools
import math

import jax
import jax.numpy as jnp
from jax.experimental import pallas as pl
from jax.experimental.pallas import tpu as pltpu


def _softplus(x, threshold=5.0):
    # PyTorch Softplus(beta=1.0, threshold=5.0): linear above the threshold.
    return jnp.where(x > threshold, x,
                     jnp.log1p(jnp.exp(jnp.minimum(x, threshold))))


def _gffn_kernel(xr_ref, xi_ref, w1r_ref, w1i_ref, b1r_ref, b1i_ref,
                 w2_ref, b2_ref, *rest, p, scale, training):
    if training:
        rand_ref, o_ref = rest
    else:
        (o_ref,) = rest

    h_r = jnp.dot(xr_ref[...], w1r_ref[...],
                  preferred_element_type=jnp.float32) + b1r_ref[...]
    h_i = jnp.dot(xi_ref[...], w1i_ref[...],
                  preferred_element_type=jnp.float32) + b1i_ref[...]

    g = _softplus(h_r) * jnp.tanh(h_i)

    if training:
        keep = rand_ref[...] >= jnp.float32(p)
        g = jnp.where(keep, g * jnp.float32(scale), jnp.zeros_like(g))

    out = jnp.dot(g, w2_ref[...],
                  preferred_element_type=jnp.float32) + b2_ref[...]
    o_ref[...] = out.astype(o_ref.dtype)


def _round_up(n, m):
    return ((n + m - 1) // m) * m


def gated_feed_forward(x, params, *, p=0.1, training=False, dropout_key=None):
    """JAX/Pallas equivalent of GatedFeedForward.forward.

    params:
      w1r, w1i: (feat_dim, hid_dim)   -- already transposed vs. torch Linear
      b1r, b1i: (hid_dim,)
      w2:       (hid_dim, feat_dim)
      b2:       (feat_dim,)
    """
    if jnp.iscomplexobj(x):
        x_real, x_imag = jnp.real(x), jnp.imag(x)
    else:
        x_real, x_imag = x, x

    lead = x_real.shape[:-1]
    feat = x_real.shape[-1]
    hid = params["w1r"].shape[-1]

    xr2 = x_real.reshape(-1, feat).astype(jnp.float32)
    xi2 = x_imag.reshape(-1, feat).astype(jnp.float32)
    m = xr2.shape[0]

    apply_dropout = bool(training) and p > 0.0
    scale = 1.0 / (1.0 - p) if apply_dropout else 1.0

    # Row tiling: one grid axis over row tiles; weights resident across steps.
    tile_m = min(256, _round_up(m, 8))
    m_pad = _round_up(m, tile_m)
    if m_pad != m:
        pad = ((0, m_pad - m), (0, 0))
        xr2 = jnp.pad(xr2, pad)
        xi2 = jnp.pad(xi2, pad)

    w1r = params["w1r"].astype(jnp.float32)
    w1i = params["w1i"].astype(jnp.float32)
    w2 = params["w2"].astype(jnp.float32)
    b1r = params["b1r"].astype(jnp.float32).reshape(1, hid)
    b1i = params["b1i"].astype(jnp.float32).reshape(1, hid)
    b2 = params["b2"].astype(jnp.float32).reshape(1, feat)

    grid = (m_pad // tile_m,)

    def row_spec(last):
        return pl.BlockSpec((tile_m, last), lambda i: (i, 0))

    def full_spec(shape):
        return pl.BlockSpec(shape, lambda i: (0, 0))

    in_specs = [
        row_spec(feat), row_spec(feat),          # x_real, x_imag tiles
        full_spec((feat, hid)), full_spec((feat, hid)),   # W1r, W1i
        full_spec((1, hid)), full_spec((1, hid)),         # b1r, b1i
        full_spec((hid, feat)), full_spec((1, feat)),     # W2, b2
    ]
    args = [xr2, xi2, w1r, w1i, b1r, b1i, w2, b2]

    if apply_dropout:
        if dropout_key is None:
            dropout_key = jax.random.PRNGKey(0)
        u = jax.random.uniform(dropout_key, (m, hid), dtype=jnp.float32)
        if m_pad != m:
            u = jnp.pad(u, ((0, m_pad - m), (0, 0)))
        in_specs.append(row_spec(hid))
        args.append(u)

    kernel = functools.partial(_gffn_kernel, p=float(p), scale=float(scale),
                               training=apply_dropout)

    out2 = pl.pallas_call(
        kernel,
        out_shape=jax.ShapeDtypeStruct((m_pad, feat), jnp.float32),
        grid=grid,
        in_specs=in_specs,
        out_specs=pl.BlockSpec((tile_m, feat), lambda i: (i, 0)),
        compiler_params=pltpu.CompilerParams(
            dimension_semantics=("parallel",)),
    )(*args)

    return out2[:m].reshape(*lead, feat)


def gffn_reference(x, params, *, p=0.1, training=False, dropout_key=None):
    """Pure-JAX reference mirroring the PyTorch module (same dropout key)."""
    if jnp.iscomplexobj(x):
        x_real, x_imag = jnp.real(x), jnp.imag(x)
    else:
        x_real, x_imag = x, x
    lead = x_real.shape[:-1]
    feat = x_real.shape[-1]
    hid = params["w1r"].shape[-1]
    xr2 = x_real.reshape(-1, feat).astype(jnp.float32)
    xi2 = x_imag.reshape(-1, feat).astype(jnp.float32)

    hp = jax.lax.Precision.HIGHEST
    h_r = jnp.dot(xr2, params["w1r"], precision=hp) + params["b1r"]
    h_i = jnp.dot(xi2, params["w1i"], precision=hp) + params["b1i"]
    g = _softplus(h_r) * jnp.tanh(h_i)
    if training and p > 0.0:
        if dropout_key is None:
            dropout_key = jax.random.PRNGKey(0)
        u = jax.random.uniform(dropout_key, (xr2.shape[0], hid),
                               dtype=jnp.float32)
        g = jnp.where(u >= p, g / (1.0 - p), 0.0)
    out = jnp.dot(g, params["w2"], precision=hp) + params["b2"]
    return out.reshape(*lead, feat)


if __name__ == "__main__":
    key = jax.random.PRNGKey(0)
    k_xr, k_xi, k_w1r, k_w1i, k_w2, k_drop = jax.random.split(key, 6)

    B, S, FEAT, HID = 2, 8, 32, 64
    x_real = jax.random.normal(k_xr, (B, S, FEAT), dtype=jnp.float32)
    x_imag = jax.random.normal(k_xi, (B, S, FEAT), dtype=jnp.float32)
    x = jax.lax.complex(x_real, x_imag)  # complex64 input, like the module

    def xavier_uniform(k, shape):
        fan_in, fan_out = shape
        a = math.sqrt(6.0 / (fan_in + fan_out))
        return jax.random.uniform(k, shape, jnp.float32, -a, a)

    params = {
        "w1r": xavier_uniform(k_w1r, (FEAT, HID)),
        "w1i": xavier_uniform(k_w1i, (FEAT, HID)),
        "w2": xavier_uniform(k_w2, (HID, FEAT)),
        "b1r": jnp.zeros((HID,), jnp.float32),
        "b1i": jnp.zeros((HID,), jnp.float32),
        "b2": jnp.zeros((FEAT,), jnp.float32),
    }

    # Eval mode: dropout is identity.
    out_eval = jax.block_until_ready(
        gated_feed_forward(x, params, p=0.1, training=False))
    ref_eval = gffn_reference(x, params, p=0.1, training=False)
    assert out_eval.shape == (B, S, FEAT)
    assert out_eval.dtype == jnp.float32
    assert bool(jnp.allclose(out_eval, ref_eval, atol=1e-2, rtol=1e-2))

    # Training mode: dropout active; the reference uses the same key -> same mask.
    out_trn = jax.block_until_ready(
        gated_feed_forward(x, params, p=0.1, training=True, dropout_key=k_drop))
    ref_trn = gffn_reference(x, params, p=0.1, training=True,
                             dropout_key=k_drop)
    assert out_trn.shape == (B, S, FEAT)
    assert bool(jnp.allclose(out_trn, ref_trn, atol=1e-2, rtol=1e-2))

    print("KERNEL_OK")
</pallas_src>

<mosaic_0001>
module attributes {stable_mosaic.version = 11 : i64} {
  func.func @_gffn_kernel(%arg0: i32, %arg1: memref<16x32xf32, #tpu.memory_space<vmem>>, %arg2: memref<16x32xf32, #tpu.memory_space<vmem>>, %arg3: memref<32x64xf32, #tpu.memory_space<vmem>>, %arg4: memref<32x64xf32, #tpu.memory_space<vmem>>, %arg5: memref<1x64xf32, #tpu.memory_space<vmem>>, %arg6: memref<1x64xf32, #tpu.memory_space<vmem>>, %arg7: memref<64x32xf32, #tpu.memory_space<vmem>>, %arg8: memref<1x32xf32, #tpu.memory_space<vmem>>, %arg9: memref<16x32xf32, #tpu.memory_space<vmem>>) attributes {dimension_semantics = [#tpu.dimension_semantics<parallel>], iteration_bounds = array<i64: 1>, scalar_prefetch = 0 : i64, scratch_operands = 0 : i64, tpu.core_type = #tpu.core_type<tc>, window_params = [{transform_indices = @transform_0, window_bounds = array<i64: 16, 32>}, {transform_indices = @transform_1, window_bounds = array<i64: 16, 32>}, {pipeline_mode = #tpu.pipeline_mode<synchronous>, transform_indices = @transform_2, window_bounds = array<i64: 32, 64>}, {pipeline_mode = #tpu.pipeline_mode<synchronous>, transform_indices = @transform_3, window_bounds = array<i64: 32, 64>}, {pipeline_mode = #tpu.pipeline_mode<synchronous>, transform_indices = @transform_4, window_bounds = array<i64: 1, 64>}, {pipeline_mode = #tpu.pipeline_mode<synchronous>, transform_indices = @transform_5, window_bounds = array<i64: 1, 64>}, {pipeline_mode = #tpu.pipeline_mode<synchronous>, transform_indices = @transform_6, window_bounds = array<i64: 64, 32>}, {pipeline_mode = #tpu.pipeline_mode<synchronous>, transform_indices = @transform_7, window_bounds = array<i64: 1, 32>}, {transform_indices = @transform_8, window_bounds = array<i64: 16, 32>}]} {
    %c0 = arith.constant 0 : index
    %c0_0 = arith.constant 0 : index
    %0 = vector.load %arg1[%c0, %c0_0] : memref<16x32xf32, #tpu.memory_space<vmem>>, vector<16x32xf32>
    %c0_1 = arith.constant 0 : index
    %c0_2 = arith.constant 0 : index
    %1 = vector.load %arg3[%c0_1, %c0_2] : memref<32x64xf32, #tpu.memory_space<vmem>>, vector<32x64xf32>
    %cst = arith.constant dense<0.000000e+00> : vector<16x64xf32>
    %2 = tpu.matmul %0, %1, %cst {dimension_numbers = #tpu.dot_dimension_numbers<[1], [0], [0], [1], [0, 0, 1, 1], [], []>} : vector<16x32xf32>, vector<32x64xf32>, vector<16x64xf32> -> vector<16x64xf32>
    %c0_3 = arith.constant 0 : index
    %c0_4 = arith.constant 0 : index
    %3 = vector.load %arg5[%c0_3, %c0_4] : memref<1x64xf32, #tpu.memory_space<vmem>>, vector<1x64xf32>
    %4 = vector.broadcast %3 : vector<1x64xf32> to vector<16x64xf32>
    %5 = arith.addf %2, %4 : vector<16x64xf32>
    %c0_5 = arith.constant 0 : index
    %c0_6 = arith.constant 0 : index
    %6 = vector.load %arg2[%c0_5, %c0_6] : memref<16x32xf32, #tpu.memory_space<vmem>>, vector<16x32xf32>
    %c0_7 = arith.constant 0 : index
    %c0_8 = arith.constant 0 : index
    %7 = vector.load %arg4[%c0_7, %c0_8] : memref<32x64xf32, #tpu.memory_space<vmem>>, vector<32x64xf32>
    %cst_9 = arith.constant dense<0.000000e+00> : vector<16x64xf32>
    %8 = tpu.matmul %6, %7, %cst_9 {dimension_numbers = #tpu.dot_dimension_numbers<[1], [0], [0], [1], [0, 0, 1, 1], [], []>} : vector<16x32xf32>, vector<32x64xf32>, vector<16x64xf32> -> vector<16x64xf32>
    %c0_10 = arith.constant 0 : index
    %c0_11 = arith.constant 0 : index
    %9 = vector.load %arg6[%c0_10, %c0_11] : memref<1x64xf32, #tpu.memory_space<vmem>>, vector<1x64xf32>
    %10 = vector.broadcast %9 : vector<1x64xf32> to vector<16x64xf32>
    %11 = arith.addf %8, %10 : vector<16x64xf32>
    %cst_12 = arith.constant 5.000000e+00 : f32
    %12 = vector.broadcast %cst_12 : f32 to vector<16x64xf32>
    %13 = arith.cmpf ogt, %5, %12 : vector<16x64xf32>
    %cst_13 = arith.constant 5.000000e+00 : f32
    %14 = vector.broadcast %cst_13 : f32 to vector<16x64xf32>
    %15 = arith.minimumf %5, %14 : vector<16x64xf32>
    %16 = math.exp %15 : vector<16x64xf32>
    %17 = math.log1p %16 : vector<16x64xf32>
    %18 = arith.select %13, %5, %17 : vector<16x64xi1>, vector<16x64xf32>
    %19 = math.tanh %11 : vector<16x64xf32>
    %20 = arith.mulf %18, %19 : vector<16x64xf32>
    %c0_14 = arith.constant 0 : index
    %c0_15 = arith.constant 0 : index
    %21 = vector.load %arg7[%c0_14, %c0_15] : memref<64x32xf32, #tpu.memory_space<vmem>>, vector<64x32xf32>
    %cst_16 = arith.constant dense<0.000000e+00> : vector<16x32xf32>
    %22 = tpu.matmul %20, %21, %cst_16 {dimension_numbers = #tpu.dot_dimension_numbers<[1], [0], [0], [1], [0, 0, 1, 1], [], []>} : vector<16x64xf32>, vector<64x32xf32>, vector<16x32xf32> -> vector<16x32xf32>
    %c0_17 = arith.constant 0 : index
    %c0_18 = arith.constant 0 : index
    %23 = vector.load %arg8[%c0_17, %c0_18] : memref<1x32xf32, #tpu.memory_space<vmem>>, vector<1x32xf32>
    %24 = vector.broadcast %23 : vector<1x32xf32> to vector<16x32xf32>
    %25 = arith.addf %22, %24 : vector<16x32xf32>
    %c0_19 = arith.constant 0 : index
    %c0_20 = arith.constant 0 : index
    %26 = vector.load %arg9[%c0_19, %c0_20] : memref<16x32xf32, #tpu.memory_space<vmem>>, vector<16x32xf32>
    tpu.vector_store %arg9[%c0_19, %c0_20], %25 {strides = array<i32>} : memref<16x32xf32, #tpu.memory_space<vmem>>, vector<16x32xf32>,
    return
  }
  func.func @transform_0(%arg0: i32) -> (i32, i32) {
    %c0_i32 = arith.constant 0 : i32
    %c0_i32_0 = arith.constant 0 : i32
    return %arg0, %c0_i32 : i32, i32
  }
  func.func @transform_1(%arg0: i32) -> (i32, i32) {
    %c0_i32 = arith.constant 0 : i32
    %c0_i32_0 = arith.constant 0 : i32
    return %arg0, %c0_i32 : i32, i32
  }
  func.func @transform_2(%arg0: i32) -> (i32, i32) {
    %c0_i32 = arith.constant 0 : i32
    %c0_i32_0 = arith.constant 0 : i32
    %c0_i32_1 = arith.constant 0 : i32
    return %c0_i32, %c0_i32_0 : i32, i32
  }
  func.func @transform_3(%arg0: i32) -> (i32, i32) {
    %c0_i32 = arith.constant 0 : i32
    %c0_i32_0 = arith.constant 0 : i32
    %c0_i32_1 = arith.constant 0 : i32
    return %c0_i32, %c0_i32_0 : i32, i32
  }
  func.func @transform_4(%arg0: i32) -> (i32, i32) {
    %c0_i32 = arith.constant 0 : i32
    %c0_i32_0 = arith.constant 0 : i32
    %c0_i32_1 = arith.constant 0 : i32
    return %c0_i32, %c0_i32_0 : i32, i32
  }
  func.func @transform_5(%arg0: i32) -> (i32, i32) {
    %c0_i32 = arith.constant 0 : i32
    %c0_i32_0 = arith.constant 0 : i32
    %c0_i32_1 = arith.constant 0 : i32
    return %c0_i32, %c0_i32_0 : i32, i32
  }
  func.func @transform_6(%arg0: i32) -> (i32, i32) {
    %c0_i32 = arith.constant 0 : i32
    %c0_i32_0 = arith.constant 0 : i32
    %c0_i32_1 = arith.constant 0 : i32
    return %c0_i32, %c0_i32_0 : i32, i32
  }
  func.func @transform_7(%arg0: i32) -> (i32, i32) {
    %c0_i32 = arith.constant 0 : i32
    %c0_i32_0 = arith.constant 0 : i32
    %c0_i32_1 = arith.constant 0 : i32
    return %c0_i32, %c0_i32_0 : i32, i32
  }
  func.func @transform_8(%arg0: i32) -> (i32, i32) {
    %c0_i32 = arith.constant 0 : i32
    %c0_i32_0 = arith.constant 0 : i32
    return %arg0, %c0_i32 : i32, i32
  }
}

</mosaic_0001>

<bundles_post_ra>
// kernel: tpu_custom_call.1
= control target key start
LH: loop header
LB: loop body
LE: loop exit
PB: predicated region body
PF: predicated region fallthrough
CT: control target
= control target key end

     0   :  { %vm40_vm0 = vcmask 261120   ;;  %s387_s0 = inlined_call_operand.vmem [shape: f32[16,32], index: 0, kind: input, shape index: {}]   ;;  %s388_s1 = inlined_call_operand.vmem [shape: f32[16,32], index: 1, kind: input, shape index: {}]   ;;  %s389_s2 = inlined_call_operand.vmem [shape: f32[32,64], index: 2, kind: input, shape index: {}]   ;;  %s390_s3 = inlined_call_operand.vmem [shape: f32[32,64], index: 3, kind: input, shape index: {}]   ;;  %s391_s4 = inlined_call_operand.vmem [shape: f32[1,64], index: 4, kind: input, shape index: {}]   ;;  %s392_s5 = inlined_call_operand.vmem [shape: f32[1,64], index: 5, kind: input, shape index: {}]   ;;  %s393_s6 = inlined_call_operand.vmem [shape: f32[64,32], index: 6, kind: input, shape index: {}]   ;;  %s394_s7 = inlined_call_operand.vmem [shape: f32[1,32], index: 7, kind: input, shape index: {}]   ;;  %s395_s8 = inlined_call_operand.hbm [shape: f32[16,32], index: 8, kind: output, shape index: {}]  }
   0x1   :  { %v35_v0 = vld [vmem:[%s389_s2 + $0x18] sm:$0xff]  ;;  %v34_v1 = vld [vmem:[%s389_s2 + $0x10] sm:$0xff]  ;;  %v33_v2 = vld [vmem:[%s389_s2 + $0x8] sm:$0xff] }
   0x2   :  { %59 = vmatpush.msra.mxu0 %v35_v0  ;;  %v75_v3 = vld [vmem:[%s390_s3 + $0x18] sm:$0xff]  ;;  %v74_v4 = vld [vmem:[%s390_s3 + $0x10] sm:$0xff]  ;;  %v32_v5 = vld [vmem:[%s389_s2] sm:$0xff] }
   0x3   :  { %98 = vmatpush.msra.mxu1 %v75_v3  ;;  %v73_v6 = vld [vmem:[%s390_s3 + $0x8] sm:$0xff]  ;;  %v30_v7 = vld [vmem:[%s387_s0] sm:$0xff] }
   0x4   :  { %60 = vmatpush.msra.mxu0 %v34_v1 }
   0x5   :  { %99 = vmatpush.msra.mxu1 %v74_v4 }
   0x6   :  { %61 = vmatpush.msra.mxu0 %v33_v2 }
   0x7   :  { %13 = vsyncpa [#allocation3], 0  ;;  %v72_v8 = vld [vmem:[%s390_s3] sm:$0xff]  ;;  %100 = vmatpush.msra.mxu1 %v73_v6  ;;  %v31_v10 = vld [vmem:[%s387_s0 + $0x8] sm:$0xff]  ;;  %vm153_vm3 = vcmask 523264   ;;  %s191_s25 = sshll.u32 %s395_s8, 4  ;;  %s192_s25 = int_to_ptr.hbm [resolvable:$true] %s191_s25 }
   0x8   :  { %62 = vmatpush.msra.mxu0 %v32_v5  ;;  %v70_v9 = vld [vmem:[%s388_s1] sm:$0xff]  ;;  %v71_v11 = vld [vmem:[%s388_s1 + $0x8] sm:$0xff]  ;;  %v148_v12 = vld [vmem:[%s393_s6 + $0x38] sm:$0xff]  ;;  %s262_s26 = smov 128   ;;  %s263_s27 = smov 8  }
   0x9   :  { %203 = vmatmul.msk.f32.vlgmr.msra.gmra.mxu0 %vm40_vm0, %v30_v7  ;;  %101 = vmatpush.msra.mxu1 %v72_v8  ;;  %v147_v13 = vld [vmem:[%s393_s6 + $0x30] sm:$0xff]  ;;  %v146_v14 = vld [vmem:[%s393_s6 + $0x28] sm:$0xff]  ;;  %v145_v15 = vld [vmem:[%s393_s6 + $0x20] sm:$0xff] }
   0xa   :  { %205 = vmatmul.msk.f32.vlgmr.msra.gmra.mxu1 %vm40_vm0, %v70_v9  ;;  %168 = vmatpush.msra.mxu2 %v148_v12  ;;  %v144_v16 = vld [vmem:[%s393_s6 + $0x18] sm:$0xff]  ;;  %v143_v17 = vld [vmem:[%s393_s6 + $0x10] sm:$0xff]  ;;  %v142_v18 = vld [vmem:[%s393_s6 + $0x8] sm:$0xff] }
   0xb   :  { %209 = vmatpush.msra.mxu3 %v148_v12  ;;  %v141_v19 = vld [vmem:[%s393_s6] sm:$0xff]  ;;  %s261_s6 = smov [#allocation2]  }
   0xc   :  { %169 = vmatpush.msra.mxu2 %v147_v13  ;;  %v220_v20 = vld [vmem:[%s391_s4] ss:$0 sm:$0xff]  ;;  %s189_s2 = sshll.u32 %s261_s6, 4  ;;  %s190_s2 = int_to_ptr.vmem [resolvable:$true] %s189_s2 }
   0xd   :  { %210 = vmatpush.msra.mxu3 %v147_v13  ;;  %v221_v28 = vld [vmem:[%s392_s5] ss:$0 sm:$0xff] }
   0xe   :  { %170 = vmatpush.msra.mxu2 %v146_v14  ;;  %v222_v58 = vld [vmem:[%s394_s7] ss:$0 sm:$0xff] }
   0xf   :  { %211 = vmatpush.msra.mxu3 %v146_v14 }
  0x10   :  { %171 = vmatpush.msra.mxu2 %v145_v15 }
  0x11   :  { %204 = vmatmul.msk.f32.gmra.mxu0 %vm40_vm0, %v31_v10  ;;  %212 = vmatpush.msra.mxu3 %v145_v15 }
  0x12   :  { %206 = vmatmul.msk.f32.gmra.mxu1 %vm40_vm0, %v71_v11  ;;  %172 = vmatpush.msra.mxu2 %v144_v16 }
  0x13   :  { %213 = vmatpush.msra.mxu3 %v144_v16 }
  0x14   :  { %173 = vmatpush.msra.mxu2 %v143_v17 }
  0x15   :  { %214 = vmatpush.msra.mxu3 %v143_v17 }
  0x16   :  { %174 = vmatpush.msra.mxu2 %v142_v18 }
  0x17   :  { %215 = vmatpush.msra.mxu3 %v142_v18 }
  0x18   :  { %175 = vmatpush.msra.mxu2 %v141_v19 }
  0x19   :  { %216 = vmatpush.msra.mxu3 %v141_v19 }
  0x86   :  { %v64_v21 = vpop.f32.mrf.mxu0 }
  0x87   :  { %v65_v22 = vadd.f32 %v220_v20, %v64_v21  ;;  %v103_v27 = vpop.f32.mrf.mxu1 }
  0x88   :  { %v104_v32 = vadd.f32 %v221_v28, %v103_v27 }
  0x89   :  { %v111_v23 = vmin.f32 %v65_v22, 5.0  ;;  %vm109_vm2 = vcmp.gt.f32.partialorder %v65_v22, 5.0 }
  0x8b   :  { %v113_v24 = vmul.f32 1.442695, %v111_v23 }
  0x8d   :  { %223 = vpow2.f32 %v113_v24 }
  0x8e   :  { %v67_v25 = vpop.f32.mrf.mxu0 }
  0x8f   :  { %v68_v26 = vadd.f32 %v220_v20, %v67_v25  ;;  %v106_v35 = vpop.f32.mrf.mxu1 }
  0x90   :  { %v107_v40 = vadd.f32 %v221_v28, %v106_v35 }
  0x91   :  { %v112_v29 = vmin.f32 %v68_v26, 5.0  ;;  %vm110_vm5 = vcmp.gt.f32.partialorder %v68_v26, 5.0 }
  0x93   :  { %v224_v30 = vpop.eup %223  ;;  %v115_v31 = vmul.f32 1.442695, %v112_v29 }
  0x94   :  { %v117_v33 = vadd.f32 1.0, %v224_v30  ;;  %v120_v34 = vmul.f32 -0.5, %v224_v30  ;;  %v123_v37 = vand.u32 2147483647, %v224_v30 }
  0x95   :  { %225 = vpow2.f32 %v115_v31 }
  0x96   :  { %227 = vlog2.f32 %v117_v33  ;;  %v121_v36 = vadd.f32 1.0, %v120_v34  ;;  %vm124_vm1 = vcmp.lt.f32.partialorder %v123_v37, 0.0004427343 }
  0x97   :  { %229 = vtanh.f32 %v104_v32 }
  0x98   :  { %v122_v43 = vmul.f32 %v224_v30, %v121_v36 }
  0x9b   :  { %v226_v38 = vpop.eup %225 }
  0x9c   :  { %v228_v39 = vpop.eup %227  ;;  %v126_v41 = vadd.f32 1.0, %v226_v38  ;;  %v129_v44 = vmul.f32 -0.5, %v226_v38  ;;  %v132_v50 = vand.u32 2147483647, %v226_v38 }
  0x9d   :  { %v119_v42 = vmul.f32 0.6931472, %v228_v39  ;;  %v230_v45 = vpop.eup %229 }
  0x9e   :  { %231 = vlog2.f32 %v126_v41  ;;  %v130_v49 = vadd.f32 1.0, %v129_v44  ;;  %vm133_vm4 = vcmp.lt.f32.partialorder %v132_v50, 0.0004427343 }
  0x9f   :  { %v125_v46 = vsel %vm124_vm1, %v122_v43, %v119_v42  ;;  %233 = vtanh.f32 %v107_v40 }
  0xa0   :  { %v135_v47 = vsel %vm109_vm2, %v65_v22, %v125_v46  ;;  %v131_v53 = vmul.f32 %v226_v38, %v130_v49 }
  0xa1   :  { %v139_v48 = vmul.f32 %v230_v45, %v135_v47 }
  0xa3   :  { %207 = vmatmul.msk.f32.vlgmr.msra.gmra.mxu2 %vm153_vm3, %v139_v48 }
  0xa4   :  { %v232_v51 = vpop.eup %231 }
  0xa5   :  { %v128_v52 = vmul.f32 0.6931472, %v232_v51  ;;  %v234_v54 = vpop.eup %233 }
  0xa7   :  { %v134_v55 = vsel %vm133_vm4, %v131_v53, %v128_v52 }
  0xa8   :  { %v136_v56 = vsel %vm110_vm5, %v68_v26, %v134_v55 }
  0xa9   :  { %v140_v57 = vmul.f32 %v234_v54, %v136_v56 }
  0xab   :  { %208 = vmatmul.msk.f32.vlgmr.msra.gmra.mxu3 %vm153_vm3, %v140_v57 }
 0x126   :  { %v177_v59 = vpop.f32.mrf.mxu2 }
 0x127   :  { %v178_v60 = vadd.f32 %v222_v58, %v177_v59 }
 0x129   :  { %183 = vst.msk [vmem:[#allocation2] sm:$0xff] %vm40_vm0, %v178_v60 }
 0x12e   :  { %v180_v61 = vpop.f32.mrf.mxu3 }
 0x12f   :  { %v181_v62 = vadd.f32 %v222_v58, %v180_v61 }
 0x131   :  { %184 = vst.msk [vmem:[#allocation2 + $0x8] sm:$0xff] %vm40_vm0, %v181_v62 }
 0x132   :  { %197 = dma.vmem_to_hbm [thread:$0]  %s190_s2, 256, %s192_s25, [#allocation3], %s262_s26, %s262_s26, %s263_s27  }
 0x133   :  { %259 = dma.done.wait [#allocation3], 256  }
 0x134   :  { %260 = vsyncadd [#allocation3], 4294967040 }
 0x135   :  { %202 = vsyncpa [#allocation3], 1 }

</bundles_post_ra>
